<compile_context>
chip_gen: v6e
topology: v6e:2x2x1
jax: 0.10.0
libtpu: 0.0.40
codegen_flags: <defaults>
</compile_context>

<pallas_src>
import functools

import jax
import jax.numpy as jnp
from jax import lax
from jax.experimental import pallas as pl
from jax.experimental.pallas import tpu as pltpu


def _round_up(a, b):
    return -(-a // b) * b


def _pool_relu_fc_kernel(x_ref, w_ref, b_ref, o_ref, *, k, wpd, wu):
    """One grid step: TR packed rows -> (TR, G*planes) lane-dense output rows.

    x_ref : (TR, G*s*Wpd)   packed rows: G output rows x s input H-rows x Wpd
    w_ref : (wu, G*planes)  block-diagonal stride-expanded FC weight
    b_ref : (1, G*planes)   f32 bias tiled G times
    o_ref : (TR, G*planes)
    """
    # 2-D max-pool as k*k lane-offset reads + running max (f32 on the VPU).
    m = None
    for ki in range(k):
        for kj in range(k):
            d = ki * wpd + kj
            tap = x_ref[:, d:d + wu].astype(jnp.float32)
            m = tap if m is None else jnp.maximum(m, tap)

    # ReLU *before* the matmul: -inf padding lanes become 0 before multiplying
    # the zero rows of the expanded weight (avoids -inf * 0 = NaN in the MXU).
    act = jnp.maximum(m, 0.0).astype(w_ref.dtype)

    # Stride-s lane compaction + FC fused into one MXU pass; rows j*s of each
    # diagonal block hold wt[j], everything else is zero -> output row is
    # G*planes (=128) lanes dense.
    h = jnp.dot(act, w_ref[...], preferred_element_type=jnp.float32)
    o_ref[...] = (h + b_ref[...]).astype(o_ref.dtype)


def _hbm_budget():
    """Per-generation step size / VMEM cap (v7x: 64 MiB VMEM, v5e/v6e: 128)."""
    try:
        kind = jax.devices()[0].device_kind.lower()
    except Exception:  # pragma: no cover - conservative fallback
        kind = ""
    if "v7" in kind or "7x" in kind:
        return 4 << 20, 40 << 20          # target HBM bytes / step, VMEM limit
    if "v5" in kind:
        return 6 << 20, 48 << 20
    return 8 << 20, 64 << 20              # v6e / default


def _pick_row_tile(rtot, align, row_bytes, target_bytes, max_rows=8192):
    """Packed rows per grid step.

    Keeps the sublane dim aligned (8 f32 / 16 bf16), prefers tiles that divide
    the row count exactly (no padding pass), and keeps >= 2 grid steps on small
    problems so the DMA pipeline / both v7x TensorCores stay busy.
    """
    if rtot <= align:
        return rtot, rtot                                  # single full-extent block
    target = max(align, min(max_rows, target_bytes // max(row_bytes, 1)))
    target = max(align, (target // align) * align)
    if rtot <= 2 * target:
        half = _round_up(rtot, 2) // 2
        tr = (half // align) * align
        if tr >= align and rtot % tr == 0:
            return tr, rtot                                # no padding needed
        tr = _round_up(half, align)
        return tr, _round_up(rtot, tr)
    best, cand = 0, target
    while cand >= align:                                   # prefer exact divisors
        if rtot % cand == 0:
            best = cand
            break
        cand -= align
    if best >= max(align, target // 4):
        return best, rtot
    return target, _round_up(rtot, target)


@functools.partial(
    jax.jit, static_argnames=("kernel_size", "stride", "padding", "compute_dtype"))
def max_relu_fc(x, w_fc, b_fc, *, kernel_size, stride, padding, compute_dtype=None):
    """MaxPool2d(k, s, p) -> ReLU -> Linear over the pooled width (NCHW input)."""
    N, C, H, W = x.shape
    planes, inplanes = w_fc.shape
    k, s, p = int(kernel_size), int(stride), int(padding)
    Hp = (H + 2 * p - k) // s + 1
    Wp = (W + 2 * p - k) // s + 1
    assert Wp == inplanes, "pooled width must equal fc in_features"
    if k > s:
        # TODO(synk): overlapping pooling windows (k > s) need a per-tap gather
        # layout; the packed stride-s row layout below assumes k <= s.
        raise NotImplementedError("fused max_relu_fc assumes k <= s")

    dtype = jnp.dtype(compute_dtype) if compute_dtype is not None else x.dtype
    itm = dtype.itemsize

    Hs = Hp * s                       # input H rows consumed per image (floor mode)
    Wpd = W + 2 * p                   # padded width
    G = max(1, 128 // planes)         # output rows packed per (128-lane) row
    Gp = G * planes                   # packed output lane width
    Lin = G * s * Wpd                 # packed input lane width
    shift = (k - 1) * Wpd + (k - 1)   # largest pooling-tap lane offset
    Wu = Lin - shift                  # activation width fed to the MXU

    # ---- tile / grid selection ------------------------------------------------
    M = N * C * Hp                                     # total output rows
    rtot = -(-M // G)                                  # packed rows
    align = max(8, 32 // itm)                          # 8 (f32) / 16 (bf16) sublanes
    target_bytes, vmem_cap = _hbm_budget()
    row_bytes = (Lin + Gp) * itm                       # HBM bytes per packed row
    tr, rtot_pad = _pick_row_tile(rtot, align, row_bytes, target_bytes)
    M_pad = rtot_pad * G

    # ---- input layout (reshapes are free; any pad/cast fuses into one pass) ---
    xd = x.astype(dtype).reshape(N * C, H, W)
    pad_top, pad_bot = p, max(0, Hs - p - H)
    if pad_top or pad_bot or p:
        xd = jnp.pad(xd, ((0, 0), (pad_top, pad_bot), (p, p)),
                     constant_values=-jnp.inf)         # -inf: max-pool ignores it
    if xd.shape[1] != Hs:
        xd = xd[:, :Hs, :]                             # floor-mode crop
    flat = xd.reshape(N * C * Hs, Wpd)
    if M_pad != M:
        flat = jnp.pad(flat, ((0, (M_pad - M) * s), (0, 0)))
    x_in = flat.reshape(rtot_pad, Lin)                 # packed rows

    # ---- stride-expanded block-diagonal FC weight (tiny; built once) ----------
    w_exp = jnp.zeros((s * Wpd, planes), dtype).at[jnp.arange(Wp) * s, :].set(
        w_fc.T.astype(dtype))
    w_big = jnp.kron(jnp.eye(G, dtype=dtype), w_exp)[:Wu]          # (Wu, Gp)
    b_big = jnp.tile(b_fc.astype(jnp.float32), G).reshape(1, Gp)   # f32 bias

    # ---- explicit VMEM budget ---------------------------------------------------
    blk_bytes = (2 * tr * (_round_up(Lin, 128) + _round_up(Gp, 128)) * itm
                 + _round_up(Wu, 8) * _round_up(Gp, 128) * itm)
    vmem_limit = int(min(vmem_cap, max(16 << 20, 2 * blk_bytes)))

    out = pl.pallas_call(
        functools.partial(_pool_relu_fc_kernel, k=k, wpd=Wpd, wu=Wu),
        out_shape=jax.ShapeDtypeStruct((rtot_pad, Gp), dtype),
        grid=(rtot_pad // tr,),
        in_specs=[
            pl.BlockSpec((tr, Lin), lambda i: (i, 0)),
            pl.BlockSpec((Wu, Gp), lambda i: (0, 0)),
            pl.BlockSpec((1, Gp), lambda i: (0, 0)),
        ],
        out_specs=pl.BlockSpec((tr, Gp), lambda i: (i, 0)),
        compiler_params=pltpu.CompilerParams(
            dimension_semantics=("parallel",),
            vmem_limit_bytes=vmem_limit),
    )(x_in, w_big, b_big)

    # Free reshapes back to (N, C, Hp, planes); the [:M] slice only copies when
    # row padding was actually added.
    return out.reshape(M_pad, planes)[:M].reshape(N, C, Hp, planes)


if __name__ == "__main__":
    key = jax.random.PRNGKey(0)

    def reference(x, w_fc, b_fc, k, s, p):
        pool = lax.reduce_window(
            x, -jnp.inf, lax.max,
            window_dimensions=(1, 1, k, k),
            window_strides=(1, 1, s, s),
            padding=((0, 0), (0, 0), (p, p), (p, p)))
        return jnp.maximum(pool, 0.0) @ w_fc.T + b_fc

    # ---- config 1: module-consistent small shapes (k=s=2, p=0) -----------------
    N, C, H, W = 2, 4, 16, 16
    k, s, p = 2, 2, 0
    inplanes = (W + 2 * p - k) // s + 1          # 8
    planes = 32
    kx, kw, kb = jax.random.split(key, 3)
    x = jax.random.normal(kx, (N, C, H, W), dtype=jnp.float32)

    # nn.Linear default init (weight_init() only touches Conv2d / norm layers).
    bound = 1.0 / float(inplanes) ** 0.5
    w_fc = jax.random.uniform(kw, (planes, inplanes), jnp.float32, -bound, bound)
    b_fc = jax.random.uniform(kb, (planes,), jnp.float32, -bound, bound)

    h = jax.block_until_ready(
        max_relu_fc(x, w_fc, b_fc, kernel_size=k, stride=s, padding=p))
    ref = reference(x, w_fc, b_fc, k, s, p)
    assert h.shape == (N, C, (H + 2 * p - k) // s + 1, planes)
    assert jnp.allclose(h, ref, atol=1e-5, rtol=1e-5)

    # ---- config 2: padded pooling (p=1) exercises -inf padding + odd widths ----
    k2, s2, p2 = 2, 2, 1
    inplanes2 = (W + 2 * p2 - k2) // s2 + 1      # 9
    kw2, kb2 = jax.random.split(kb)
    w_fc2 = jax.random.uniform(kw2, (planes, inplanes2), jnp.float32, -bound, bound)
    b_fc2 = jax.random.uniform(kb2, (planes,), jnp.float32, -bound, bound)
    h2 = jax.block_until_ready(
        max_relu_fc(x, w_fc2, b_fc2, kernel_size=k2, stride=s2, padding=p2))
    ref2 = reference(x, w_fc2, b_fc2, k2, s2, p2)
    assert h2.shape == (N, C, (H + 2 * p2 - k2) // s2 + 1, planes)
    assert jnp.allclose(h2, ref2, atol=1e-5, rtol=1e-5)

    # ---- bf16 compute path: halves HBM traffic; pooling still in f32 -----------
    h_bf = jax.block_until_ready(
        max_relu_fc(x, w_fc, b_fc, kernel_size=k, stride=s, padding=p,
                    compute_dtype=jnp.bfloat16))
    assert h_bf.dtype == jnp.bfloat16
    assert jnp.allclose(h_bf.astype(jnp.float32), ref, atol=1e-1, rtol=5e-2)

    print("KERNEL_OK")
</pallas_src>

<mosaic_0001>
module attributes {stable_mosaic.version = 11 : i64} {
  func.func @_pool_relu_fc_kernel(%arg0: i32, %arg1: memref<8x128xf32, #tpu.memory_space<vmem>>, %arg2: memref<111x128xf32, #tpu.memory_space<vmem>>, %arg3: memref<1x128xf32, #tpu.memory_space<vmem>>, %arg4: memref<8x128xf32, #tpu.memory_space<vmem>>) attributes {dimension_semantics = [#tpu.dimension_semantics<parallel>], iteration_bounds = array<i64: 2>, scalar_prefetch = 0 : i64, scratch_operands = 0 : i64, tpu.core_type = #tpu.core_type<tc>, window_params = [{transform_indices = @transform_0, window_bounds = array<i64: 8, 128>}, {pipeline_mode = #tpu.pipeline_mode<synchronous>, transform_indices = @transform_1, window_bounds = array<i64: 111, 128>}, {pipeline_mode = #tpu.pipeline_mode<synchronous>, transform_indices = @transform_2, window_bounds = array<i64: 1, 128>}, {transform_indices = @transform_3, window_bounds = array<i64: 8, 128>}]} {
    %c0 = arith.constant 0 : index
    %c0_0 = arith.constant 0 : index
    %0 = vector.load %arg1[%c0, %c0_0] : memref<8x128xf32, #tpu.memory_space<vmem>>, vector<8x111xf32>
    %c0_1 = arith.constant 0 : index
    %c1 = arith.constant 1 : index
    %1 = vector.load %arg1[%c0_1, %c1] : memref<8x128xf32, #tpu.memory_space<vmem>>, vector<8x111xf32>
    %2 = arith.maximumf %0, %1 : vector<8x111xf32>
    %c0_2 = arith.constant 0 : index
    %c16 = arith.constant 16 : index
    %3 = vector.load %arg1[%c0_2, %c16] : memref<8x128xf32, #tpu.memory_space<vmem>>, vector<8x111xf32>
    %4 = arith.maximumf %2, %3 : vector<8x111xf32>
    %c0_3 = arith.constant 0 : index
    %c17 = arith.constant 17 : index
    %5 = vector.load %arg1[%c0_3, %c17] : memref<8x128xf32, #tpu.memory_space<vmem>>, vector<8x111xf32>
    %6 = arith.maximumf %4, %5 : vector<8x111xf32>
    %cst = arith.constant 0.000000e+00 : f32
    %7 = vector.broadcast %cst : f32 to vector<8x111xf32>
    %8 = arith.maximumf %6, %7 : vector<8x111xf32>
    %c0_4 = arith.constant 0 : index
    %c0_5 = arith.constant 0 : index
    %9 = vector.load %arg2[%c0_4, %c0_5] : memref<111x128xf32, #tpu.memory_space<vmem>>, vector<111x128xf32>
    %cst_6 = arith.constant dense<0.000000e+00> : vector<8x128xf32>
    %10 = tpu.matmul %8, %9, %cst_6 {dimension_numbers = #tpu.dot_dimension_numbers<[1], [0], [0], [1], [0, 0, 1, 1], [], []>} : vector<8x111xf32>, vector<111x128xf32>, vector<8x128xf32> -> vector<8x128xf32>
    %c0_7 = arith.constant 0 : index
    %c0_8 = arith.constant 0 : index
    %11 = vector.load %arg3[%c0_7, %c0_8] : memref<1x128xf32, #tpu.memory_space<vmem>>, vector<1x128xf32>
    %12 = vector.broadcast %11 : vector<1x128xf32> to vector<8x128xf32>
    %13 = arith.addf %10, %12 : vector<8x128xf32>
    %c0_9 = arith.constant 0 : index
    %c0_10 = arith.constant 0 : index
    %14 = vector.load %arg4[%c0_9, %c0_10] : memref<8x128xf32, #tpu.memory_space<vmem>>, vector<8x128xf32>
    tpu.vector_store %arg4[%c0_9, %c0_10], %13 {strides = array<i32>} : memref<8x128xf32, #tpu.memory_space<vmem>>, vector<8x128xf32>,
    return
  }
  func.func @transform_0(%arg0: i32) -> (i32, i32) {
    %c0_i32 = arith.constant 0 : i32
    %c0_i32_0 = arith.constant 0 : i32
    return %arg0, %c0_i32 : i32, i32
  }
  func.func @transform_1(%arg0: i32) -> (i32, i32) {
    %c0_i32 = arith.constant 0 : i32
    %c0_i32_0 = arith.constant 0 : i32
    %c0_i32_1 = arith.constant 0 : i32
    return %c0_i32, %c0_i32_0 : i32, i32
  }
  func.func @transform_2(%arg0: i32) -> (i32, i32) {
    %c0_i32 = arith.constant 0 : i32
    %c0_i32_0 = arith.constant 0 : i32
    %c0_i32_1 = arith.constant 0 : i32
    return %c0_i32, %c0_i32_0 : i32, i32
  }
  func.func @transform_3(%arg0: i32) -> (i32, i32) {
    %c0_i32 = arith.constant 0 : i32
    %c0_i32_0 = arith.constant 0 : i32
    return %arg0, %c0_i32 : i32, i32
  }
}

</mosaic_0001>

<bundles_post_ra>
// kernel: tile.8
= control target key start
LH: loop header
LB: loop body
LE: loop exit
PB: predicated region body
PF: predicated region fallthrough
CT: control target
= control target key end

     0   :  { %s22_s0 = inlined_call_operand.vmem [shape: f32[32], index: 0, kind: input, shape index: {}]   ;;  %s23_s1 = inlined_call_operand.vmem [shape: f32[4,32], index: 1, kind: output, shape index: {}]  }
   0x1   :  { %v4_v0 = vld [vmem:[%s22_s0] ss:$0 sm:$0xff] }
   0x2   :  { %5 = vst [vmem:[%s23_s1] sm:$0xf] %v4_v0 }

// kernel: tile.9
= control target key start
LH: loop header
LB: loop body
LE: loop exit
PB: predicated region body
PF: predicated region fallthrough
CT: control target
= control target key end

     0   :  { %vm8_vm0 = vcmask 261120   ;;  %s40_s8 = smov 32   ;;  %s41_s9 = smov 64   ;;  %vm14_vm1 = vcmask 1048320   ;;  %vm20_vm2 = vcmask 785920   ;;  %vm26_vm3 = vcmask 523520   ;;  %s58_s0 = inlined_call_operand.vmem [shape: f32[4,32], index: 0, kind: input, shape index: {}]   ;;  %s59_s1 = inlined_call_operand.vmem [shape: f32[1,128], index: 1, kind: output, shape index: {}]  }
   0x1   :  { %v5_v0 = vld [vmem:[%s58_s0] sm:$0xf]  ;;  %s39_s0 = smov 96  }
   0x2   :  { %6 = vst [vmem:[#allocation1] sm:$0xf] %v5_v0 }
   0x9   :  { %v11_v1 = vld [vmem:[#allocation1 + $0x3] sm:$0x1]   ;;  %v23_v2 = vld [vmem:[#allocation1 + $0x1] sm:$0x1]   ;;  %v7_v3 = vld [vmem:[#allocation1] sm:$0x1]  }
   0xa   :  { %12 = vrot.lane.b32.xlu0 %v11_v1, %s39_s0  ;;  %24 = vrot.lane.b32.xlu1 %v23_v2, %s40_s8  ;;  %v17_v4 = vld [vmem:[#allocation1 + $0x2] sm:$0x1]   ;;  %9 = vst.msk [vmem:[#allocation0] sm:$0x1] %vm8_vm0, %v7_v3  }
   0xe   :  { %18 = vrot.lane.b32.xlu0 %v17_v4, %s41_s9 }
  0x7c   :  { %v13_v5 = vpop.permute.xlu0 %12   ;;  %v25_v6 = vpop.permute.xlu1 %24  }
  0x7d   :  { %15 = vst.msk [vmem:[#allocation0] sm:$0x1] %vm14_vm1, %v13_v5  }
  0x80   :  { %v19_v7 = vpop.permute.xlu0 %18  }
  0x81   :  { %21 = vst.msk [vmem:[#allocation0] sm:$0x1] %vm20_vm2, %v19_v7  }
  0x82   :  { %27 = vst.msk [vmem:[#allocation0] sm:$0x1] %vm26_vm3, %v25_v6  }
  0x89   :  { %v32_v8 = vld [vmem:[#allocation0] sm:$0x1] }
  0x8a   :  { %35 = vst [vmem:[%s59_s1] sm:$0x1] %v32_v8 }

</bundles_post_ra>
